<compile_context>
chip_gen: v7x
topology: tpu7x:2x2x1
jax: 0.10.0
libtpu: 0.0.40
codegen_flags: <defaults>
</compile_context>

<pallas_src>
import jax
import jax.numpy as jnp
from jax.experimental import pallas as pl
from jax.experimental.pallas import tpu as pltpu

_LANES = 128


def _sublane_multiple(dtype):
    """Second-minor tiling multiple on TPU (sub-32-bit dtypes pack along sublanes)."""
    itemsize = jnp.dtype(dtype).itemsize
    return {4: 8, 2: 16, 1: 32}.get(itemsize, 8)


def _round_up(a, b):
    return (a + b - 1) // b * b


def _weakness_kernel(thr_ref, x_ref, m_ref, o_ref):
    # thr_ref: (2,) f32 SMEM scalars [max_threshold, min_threshold].
    max_t = thr_ref[0]
    min_t = thr_ref[1]
    # Inputs arrive in their native (possibly narrow) dtypes; cast in-register.
    x = x_ref[...].astype(jnp.float32)
    m = m_ref[...].astype(jnp.float32)
    # Exact PyTorch formulation (compare -> cast -> multiply), incl. Inf/NaN.
    lt_max = (x < max_t).astype(jnp.float32)
    gt_max = (x > max_t).astype(jnp.float32)
    gt_min = (x > min_t).astype(jnp.float32)
    res = lt_max * m * x + gt_min * (1.0 - m) * x + gt_max * m
    # Store downcasts to the output dtype (e.g. bf16) for free.
    o_ref[...] = res.astype(o_ref.dtype)


def weakness_forward(x, mask, max_threshold, min_threshold, *, tile_rows=4096):
    """Pallas implementation of weakness.forward. x, mask: same shape (e.g. NCHW)."""
    assert x.shape == mask.shape, "x and mask must have the same shape"
    orig_shape = x.shape
    total = x.size

    # Keep native dtypes end-to-end; only rare paths need a wrapper cast.
    if not jnp.issubdtype(x.dtype, jnp.floating):
        x = x.astype(jnp.float32)  # integer images: compute & return in f32
    if mask.dtype == jnp.bool_:
        mask = mask.astype(jnp.int8)  # stay 1 byte; avoids bool-ref edge cases
    out_dtype = x.dtype

    sub = max(_sublane_multiple(x.dtype), _sublane_multiple(mask.dtype))
    chunk = sub * _LANES
    padded_total = _round_up(total, chunk)
    pad = padded_total - total

    xf = x.reshape(-1)
    mf = mask.reshape(-1)
    if pad:  # only fires for misaligned flat sizes (single tail pad)
        xf = jnp.pad(xf, (0, pad))
        mf = jnp.pad(mf, (0, pad))
    rows = padded_total // _LANES
    x2 = xf.reshape(rows, _LANES)
    m2 = mf.reshape(rows, _LANES)

    # Tile selection: cap blocks at tile_rows (2 MiB f32 -> 12 MiB pipeline,
    # inside every generation's scoped-VMEM default), but guarantee >=2 grid
    # steps so v7x's two TensorCores both get work, preferring 4-8 steps while
    # blocks stay >= ~512 KiB-class for per-core pipelining.
    tile_cap = max(sub, _round_up(min(tile_rows, rows), sub))
    tile_r = min(tile_cap, rows)
    for steps in (8, 4, 2):
        cand = max(sub, _round_up(pl.cdiv(rows, steps), sub))
        if cand >= 1024 or steps == 2:
            tile_r = min(tile_r, cand)
            break
    grid = (pl.cdiv(rows, tile_r),)

    thr = jnp.asarray([max_threshold, min_threshold], dtype=jnp.float32)

    out2 = pl.pallas_call(
        _weakness_kernel,
        out_shape=jax.ShapeDtypeStruct((rows, _LANES), out_dtype),
        grid_spec=pltpu.PrefetchScalarGridSpec(
            num_scalar_prefetch=1,
            grid=grid,
            in_specs=[
                pl.BlockSpec((tile_r, _LANES), lambda i, thr_ref: (i, 0)),
                pl.BlockSpec((tile_r, _LANES), lambda i, thr_ref: (i, 0)),
            ],
            out_specs=pl.BlockSpec((tile_r, _LANES), lambda i, thr_ref: (i, 0)),
        ),
        compiler_params=pltpu.CompilerParams(
            dimension_semantics=("parallel",),
            vmem_limit_bytes=32 * 1024 * 1024,  # safe on v5e/v6e/v7x
        ),
    )(thr, x2, m2)

    out = out2.reshape(-1)
    if pad:
        out = out[:total]
    return out.reshape(orig_shape)


def weakness_ref(x, mask, max_t, min_t):
    """Pure-JAX reference matching the PyTorch semantics exactly."""
    x = x.astype(jnp.float32)
    mask = mask.astype(jnp.float32)
    weakness_gt_1 = (x < max_t).astype(jnp.float32) * mask * x
    ceil = (x > max_t).astype(jnp.float32) * mask
    not_mask = -mask + 1.0
    weakness_gt_0 = (x > min_t).astype(jnp.float32) * not_mask * x
    return weakness_gt_1 + weakness_gt_0 + ceil


if __name__ == "__main__":
    # Module "parameters" (thresholds) — deterministic, set in-script.
    gt_1_max_threshold = 0.8
    gt_0_min_threshold = 0.2

    key = jax.random.PRNGKey(0)
    kx, km = jax.random.split(key)
    # Small NCHW shapes consistent with the forward (elementwise image op).
    x = jax.random.uniform(kx, (2, 4, 16, 16), dtype=jnp.float32)
    mask_f32 = (jax.random.uniform(km, (2, 4, 16, 16)) > 0.5).astype(jnp.float32)
    mask_i8 = mask_f32.astype(jnp.int8)

    ref = weakness_ref(x, mask_f32, gt_1_max_threshold, gt_0_min_threshold)

    # 1) f32 x, f32 mask — matches the PyTorch module exactly.
    out_f32 = jax.block_until_ready(
        weakness_forward(x, mask_f32, gt_1_max_threshold, gt_0_min_threshold))
    assert out_f32.shape == x.shape and out_f32.dtype == jnp.float32
    assert jnp.allclose(out_f32, ref, atol=1e-6), "f32/f32 mismatch vs reference"

    # 2) f32 x, int8 (binary) mask — narrow-mask fast path, no wrapper casts.
    out_i8m = jax.block_until_ready(
        weakness_forward(x, mask_i8, gt_1_max_threshold, gt_0_min_threshold))
    assert jnp.allclose(out_i8m, ref, atol=1e-6), "f32/int8 mismatch vs reference"

    # 3) bf16 x, int8 mask — inputs stream at native width, store downcasts.
    x_bf16 = x.astype(jnp.bfloat16)
    out_bf16 = jax.block_until_ready(
        weakness_forward(x_bf16, mask_i8, gt_1_max_threshold, gt_0_min_threshold))
    ref_bf16 = weakness_ref(x_bf16, mask_f32, gt_1_max_threshold, gt_0_min_threshold)
    assert out_bf16.dtype == jnp.bfloat16
    assert jnp.allclose(out_bf16.astype(jnp.float32), ref_bf16, atol=1e-2), \
        "bf16/int8 mismatch vs reference"

    print("KERNEL_OK")
</pallas_src>

<mosaic_0001>
module attributes {stable_mosaic.version = 11 : i64} {
  func.func @_weakness_kernel(%arg0: i32, %arg1: memref<2xf32, #tpu.memory_space<smem>>, %arg2: memref<8x128xf32, #tpu.memory_space<vmem>>, %arg3: memref<8x128xf32, #tpu.memory_space<vmem>>, %arg4: memref<8x128xf32, #tpu.memory_space<vmem>>) attributes {dimension_semantics = [#tpu.dimension_semantics<parallel>], iteration_bounds = array<i64: 2>, scalar_prefetch = 1 : i64, scratch_operands = 0 : i64, tpu.core_type = #tpu.core_type<tc>, window_params = [{transform_indices = @transform_0, window_bounds = array<i64: 8, 128>}, {transform_indices = @transform_1, window_bounds = array<i64: 8, 128>}, {transform_indices = @transform_2, window_bounds = array<i64: 8, 128>}]} {
    %c0 = arith.constant 0 : index
    %0 = memref.load %arg1[%c0] : memref<2xf32, #tpu.memory_space<smem>>
    %c1 = arith.constant 1 : index
    %1 = memref.load %arg1[%c1] : memref<2xf32, #tpu.memory_space<smem>>
    %c0_0 = arith.constant 0 : index
    %c0_1 = arith.constant 0 : index
    %2 = vector.load %arg2[%c0_0, %c0_1] : memref<8x128xf32, #tpu.memory_space<vmem>>, vector<8x128xf32>
    %c0_2 = arith.constant 0 : index
    %c0_3 = arith.constant 0 : index
    %3 = vector.load %arg3[%c0_2, %c0_3] : memref<8x128xf32, #tpu.memory_space<vmem>>, vector<8x128xf32>
    %4 = vector.broadcast %0 : f32 to vector<8x128xf32>
    %5 = arith.cmpf olt, %2, %4 : vector<8x128xf32>
    %6 = arith.extui %5 : vector<8x128xi1> to vector<8x128xi32>
    %7 = arith.sitofp %6 : vector<8x128xi32> to vector<8x128xf32>
    %8 = vector.broadcast %0 : f32 to vector<8x128xf32>
    %9 = arith.cmpf ogt, %2, %8 : vector<8x128xf32>
    %10 = arith.extui %9 : vector<8x128xi1> to vector<8x128xi32>
    %11 = arith.sitofp %10 : vector<8x128xi32> to vector<8x128xf32>
    %12 = vector.broadcast %1 : f32 to vector<8x128xf32>
    %13 = arith.cmpf ogt, %2, %12 : vector<8x128xf32>
    %14 = arith.extui %13 : vector<8x128xi1> to vector<8x128xi32>
    %15 = arith.sitofp %14 : vector<8x128xi32> to vector<8x128xf32>
    %16 = arith.mulf %7, %3 : vector<8x128xf32>
    %17 = arith.mulf %16, %2 : vector<8x128xf32>
    %cst = arith.constant 1.000000e+00 : f32
    %18 = vector.broadcast %cst : f32 to vector<8x128xf32>
    %19 = arith.subf %18, %3 : vector<8x128xf32>
    %20 = arith.mulf %15, %19 : vector<8x128xf32>
    %21 = arith.mulf %20, %2 : vector<8x128xf32>
    %22 = arith.addf %17, %21 : vector<8x128xf32>
    %23 = arith.mulf %11, %3 : vector<8x128xf32>
    %24 = arith.addf %22, %23 : vector<8x128xf32>
    %c0_4 = arith.constant 0 : index
    %c0_5 = arith.constant 0 : index
    %25 = vector.load %arg4[%c0_4, %c0_5] : memref<8x128xf32, #tpu.memory_space<vmem>>, vector<8x128xf32>
    tpu.vector_store %arg4[%c0_4, %c0_5], %24 {strides = array<i32>} : memref<8x128xf32, #tpu.memory_space<vmem>>, vector<8x128xf32>,
    return
  }
  func.func @transform_0(%arg0: i32, %arg1: memref<2xf32, #tpu.memory_space<smem>>) -> (i32, i32) {
    %c0_i32 = arith.constant 0 : i32
    %c0_i32_0 = arith.constant 0 : i32
    return %arg0, %c0_i32 : i32, i32
  }
  func.func @transform_1(%arg0: i32, %arg1: memref<2xf32, #tpu.memory_space<smem>>) -> (i32, i32) {
    %c0_i32 = arith.constant 0 : i32
    %c0_i32_0 = arith.constant 0 : i32
    return %arg0, %c0_i32 : i32, i32
  }
  func.func @transform_2(%arg0: i32, %arg1: memref<2xf32, #tpu.memory_space<smem>>) -> (i32, i32) {
    %c0_i32 = arith.constant 0 : i32
    %c0_i32_0 = arith.constant 0 : i32
    return %arg0, %c0_i32 : i32, i32
  }
}

</mosaic_0001>

<bundles_post_ra>
// kernel: tpu_custom_call.1
= control target key start
LH: loop header
LB: loop body
LE: loop exit
PB: predicated region body
PF: predicated region fallthrough
CT: control target
= control target key end

     0   :  { %s799_s0 = inlined_call_operand.hbm [shape: f32[2], index: 0, kind: input, shape index: {}]   ;;  %s800_s1 = inlined_call_operand.hbm [shape: f32[16,128], index: 1, kind: input, shape index: {}]   ;;  %s801_s2 = inlined_call_operand.hbm [shape: f32[16,128], index: 2, kind: input, shape index: {}]   ;;  %s802_s3 = inlined_call_operand.hbm [shape: f32[16,128], index: 3, kind: output, shape index: {}]  }
   0x1   :  { %s404_s14 = scalar_lea.hbm %s799_s0, 16 }
   0x2   :  { %p405_p0 = scmp.ne.s32.totalorder %s799_s0, %s404_s14  ;;  %p408_p1 = scmp.lt.u32.totalorder %s404_s14, %s799_s0 }
   0x4   :  { %p410_p2 = pnand %p408_p1, %p405_p0 }
   0x6   :  { %413 = shalt.err (!%p410_p2)  }
   0x7   :  { %s548_s19 = smov [#allocation3]  }
   0x8   :  { %9 = dma.hbm_to_smem %s799_s0, 16, %s548_s19, [#allocation2] }
   0x9   :  { %518 = dma.done.wait [#allocation2], 16 }
   0xa   :  { %519 = vsyncadd [#allocation2], 4294967280 }
   0xb   :  { %11 = sfence }
   0xc   :  { %12 = vsyncpa [#allocation5], 0 }
   0xd   :  { %14 = vsyncpa [#allocation5 + $0x1], 0 }
   0xe   :  { %15 = vsyncpa [#allocation8], 0 }
   0xf   :  { %17 = vsyncpa [#allocation8 + $0x1], 0 }
  0x10   :  { %18 = vsyncpa [#allocation6], 0 }
  0x11   :  { %20 = vsyncpa [#allocation6 + $0x1], 0  ;;  %s585_s22 = smov 0   ;;  %s587_s23 = smov 0  }
  0x12   :  { %s589_s24 = smov 0   ;;  %s591_s25 = smov 0  }
  0x13 LB: > { %s606_s0 = sadd.s32 4294967295, %s546_s25   ;;  %s332_s26 = sadd.s32 4294967294, %s546_s25   ;;  %s546_s25 = sphi %s591_s25, %s821_s25   ;;  %s542_s24 = sphi %s589_s24, %s820_s24   ;;  %s538_s23 = sphi %s587_s23, %s819_s23   ;;  %s534_s22 = sphi %s585_s22, %s818_s22  }
  0x14   : > { %s610_s27 = sadd.s32 1, %s546_s25   ;;  %s33_s28 = sadd.s32 1, %s542_s24 }
  0x15   : > { %s30_s29 = ssub.s32 %s546_s25, %s610_s27  ;;  %p40_p3 = scmp.ne.s32.totalorder %s542_s24, %s538_s23 }
  0x16   : > { %p31_p4 = scmp.eq.s32.totalorder %s30_s29, 0  ;;  %p41_p5 = scmp.eq.s32.totalorder %s546_s25, 0 }
  0x17   : > { %p46_p6 = scmp.ne.s32.totalorder %s538_s23, %s534_s22  ;;  %p47_p7 = scmp.eq.s32.totalorder %s606_s0, 0 }
  0x18   : > { %s622_s30 = scalar_select %p31_p4, %s542_s24, %s33_s28  }
  0x19   : > { %p624_p8 = por %p41_p5, %p40_p3  ;;  %p628_p9 = por %p47_p7, %p46_p6 }
  0x1a   : > { %p96_p10 = scmp.eq.s32.totalorder %s606_s0, 1  ;;  %p102_p11 = scmp.eq.s32.totalorder %s332_s26, 1 }
  0x1b   : > { %s806_s5 = scalar_select %p628_p9, 1, 0 }
  0x1c   : > { %p368_p13 = scmp.lt.s32.totalorder %s546_s25, 2  ;;  %p635_p0 = por %p96_p10, %p40_p3 }
  0x1d   : > { %p639_p1 = por %p102_p11, %p46_p6  ;;  %s644_s8 = sand.u32 1, %s542_s24  }
  0x1e   : > { %s807_s6 = scalar_select %p635_p0, 1, 0 }
  0x1f   : > { %s808_s7 = scalar_select %p639_p1, 1, 0 }
  0x20   : > { %s336_s9 = sshll.u32 %s546_s25, 7  ;;  %s335_s10 = sshll.u32 %s644_s8, 3 }
  0x21   : > { %s653_s13 = scalar_lea.hbm %s800_s1, %s336_s9  ;;  %s126_s14 = scalar_lea.vmem [#allocation4], %s335_s10 }
  0x22   : > { %s133_s15 = sshll.u32 %s126_s14, 4  ;;  %p659_p2 = pnand %p368_p13, %p624_p8  ;;  %s663_s15 = int_to_ptr.vmem [resolvable:$true] %s133_s15 }
  0x23   : > { %s123_s17 = scalar_lea.sflag [#allocation5], %s644_s8  ;;  %s414_s18 = scalar_lea.hbm %s653_s13, 128 }
  0x24   : > { %p415_p5 = scmp.ne.s32.totalorder %s653_s13, %s414_s18  ;;  %p416_p6 = pneg %p659_p2 }
  0x25   : > { %s419_s21 = scalar_lea.hbm %s800_s1, 256  ;;  %p420_p8 = scmp.lt.u32.totalorder %s653_s13, %s800_s1 }
  0x26   : > { %p417_p7 = pnand %p416_p6, %p415_p5  ;;  %p421_p11 = scmp.lt.u32.totalorder %s419_s21, %s414_s18 }
  0x27   : > { %p423_p12 = scmp.lt.u32.totalorder %s414_s18, %s653_s13 }
  0x28   : > { %p418_p10 = pneg %p417_p7  ;;  %p422_p13 = por %p421_p11, %p420_p8 }
  0x2a   : > { %p424_p3 = por %p423_p12, %p422_p13 }
  0x2c   : > { %p425_p4 = pnand %p424_p3, %p418_p10 }
  0x2e   : > { %428 = shalt.err (!%p425_p4)
}
  0x2f   : > { %s429_s29 = scalar_lea.vmem %s663_s15, 128  ;;  %s549_s4 = smov [#allocation4]  }
  0x30   : > { %p430_p5 = scmp.ne.s32.totalorder %s663_s15, %s429_s29  ;;  %s434_s11 = sshll.u32 %s549_s4, 4  ;;  %s435_s11 = int_to_ptr.vmem [resolvable:$false] %s434_s11 }
  0x31   : > { %s436_s12 = scalar_lea.vmem %s435_s11, 256  ;;  %p437_p0 = scmp.lt.s32.totalorder %s663_s15, %s435_s11 }
  0x32   : > { %p432_p7 = pnand %p430_p5, %p416_p6  ;;  %p438_p8 = scmp.lt.s32.totalorder %s436_s12, %s429_s29 }
  0x34   : > { %p433_p1 = pneg %p432_p7  ;;  %p439_p11 = por %p438_p8, %p437_p0 }
  0x36   : > { %p440_p12 = pnand %p439_p11, %p433_p1 }
  0x38   : > { %443 = shalt.err (!%p440_p12)
}
  0x39   : > { %360 = dma.hbm_to_vmem [thread:$0]  (!%p659_p2), %s653_s13, 128, %s663_s15, %s123_s17  }
  0x3a   : > { %p810_p3 = scmp.lt.s32.totalorder %s546_s25, 3  ;;  %p811_p4 = scmp.ge.s32.totalorder %s546_s25, 1 }
  0x3b   : > { %s706_s20 = scalar_lea.hbm %s801_s2, %s336_s9  ;;  %s144_s21 = scalar_lea.vmem [#allocation7], %s335_s10 }
  0x3c   : > { %p697_p10 = pnand %p811_p4, %p810_p3  ;;  %s151_s26 = sshll.u32 %s144_s21, 4  ;;  %s152_s26 = int_to_ptr.vmem [resolvable:$true] %s151_s26 }
  0x3d   : > { %s141_s13 = scalar_lea.sflag [#allocation8], %s644_s8  ;;  %s444_s15 = scalar_lea.hbm %s706_s20, 128 }
  0x3e   : > { %s812_s14 = scalar_select %p697_p10, 1, 0 }
  0x3f   : > { %p445_p0 = scmp.ne.s32.totalorder %s706_s20, %s444_s15  ;;  %s449_s9 = scalar_lea.hbm %s801_s2, 256 }
  0x40   : > { %p450_p5 = scmp.lt.u32.totalorder %s706_s20, %s801_s2  ;;  %p451_p7 = scmp.lt.u32.totalorder %s449_s9, %s444_s15 }
  0x41   : > { %p447_p1 = pnand %p445_p0, %p416_p6  ;;  %p453_p11 = scmp.lt.u32.totalorder %s444_s15, %s706_s20 }
  0x42   : > { %p452_p8 = por %p451_p7, %p450_p5 }
  0x43   : > { %p448_p13 = pneg %p447_p1 }
  0x44   : > { %p454_p12 = por %p453_p11, %p452_p8 }
  0x46   : > { %p455_p3 = pnand %p454_p12, %p448_p13 }
  0x48   : > { %458 = shalt.err (!%p455_p3)
}
  0x49   : > { %s459_s8 = scalar_lea.vmem %s152_s26, 128  ;;  %s550_s10 = smov [#allocation7]  }
  0x4a   : > { %p460_p4 = scmp.ne.s32.totalorder %s152_s26, %s459_s8  ;;  %s464_s11 = sshll.u32 %s550_s10, 4  ;;  %s465_s11 = int_to_ptr.vmem [resolvable:$false] %s464_s11 }
  0x4b   : > { %s466_s12 = scalar_lea.vmem %s465_s11, 256  ;;  %p467_p9 = scmp.lt.s32.totalorder %s152_s26, %s465_s11 }
  0x4c   : > { %p462_p0 = pnand %p460_p4, %p416_p6  ;;  %p468_p10 = scmp.lt.s32.totalorder %s466_s12, %s459_s8 }
  0x4e   : > { %p463_p1 = pneg %p462_p0  ;;  %p469_p5 = por %p468_p10, %p467_p9 }
  0x50   : > { %p470_p7 = pnand %p469_p5, %p463_p1 }
  0x52   : > { %473 = shalt.err (!%p470_p7)
}
  0x53   : > { %363 = dma.hbm_to_vmem [thread:$0]  (!%p659_p2), %s706_s20, 128, %s152_s26, %s141_s13  }
  0x54   : > { %p813_p13 = scmp.ne.s32.totalorder %s812_s14, 0 }
  0x55   : > { %s733_s18 = sand.u32 (!%p813_p13), 1, %s538_s23   ;;  %p814_p9 = scmp.ne.s32.totalorder (!%p813_p13), %s806_s5, 0 }
  0x56   : > { %160 = sbr.rel (%p813_p13) target bundleno = 127 (0x7f), region = 28  ;;  %s736_s19 = sshll.u32 (!%p813_p13), %s733_s18, 3 }
  0x57   : > { %s163_s21 = scalar_lea.sflag (!%p813_p13), [#allocation5], %s733_s18  ;;  %s166_s15 = scalar_lea.vmem (!%p813_p13), [#allocation4], %s736_s19 }
  0x5d   : > { %521 = dma.done.wait (%p814_p9), %s163_s21, 128  }
  0x5e   : > { %523 = vsyncadd (%p814_p9), %s163_s21, 4294967168  ;;  %s172_s16 = scalar_lea.sflag [#allocation8], %s733_s18  ;;  %s175_s14 = scalar_lea.vmem [#allocation7], %s736_s19 }
  0x5f   : > { %525 = dma.done.wait (%p814_p9), %s172_s16, 128  }
  0x60   : > { %527 = vsyncadd (%p814_p9), %s172_s16, 4294967168  ;;  %s201_s20 = sld [smem:[#allocation3]]  ;;  %s343_s26 = sld [smem:[#allocation3 + $0x1]]  ;;  %v203_v0 = vld [vmem:[%s166_s15] sm:$0xff]  ;;  %v204_v2 = vld [vmem:[%s175_s14] sm:$0xff]  ;;  %v551_v5 = vmov 0.0  }
  0x61   : > { %v218_v4 = vsub.f32 1.0, %v204_v2  ;;  %s200_s5 = scalar_lea.vmem [#allocation9], %s736_s19  ;;  %s348_s17 = sshll.u32 %s606_s0, 7 }
  0x62   : > { %s239_s13 = sshll.u32 %s200_s5, 4  ;;  %s757_s29 = scalar_lea.hbm %s802_s3, %s348_s17  ;;  %s752_s13 = int_to_ptr.vmem [resolvable:$true] %s239_s13 }
  0x63   : > { %s226_s4 = scalar_lea.sflag [#allocation6], %s733_s18  ;;  %s474_s8 = scalar_lea.vmem %s752_s13, 128 }
  0x64   : > { %p475_p2 = scmp.ne.s32.totalorder %s752_s13, %s474_s8  ;;  %p815_p6 = scmp.ne.s32.totalorder %s807_s6, 0 }
  0x65   : > { %s552_s0 = smov [#allocation9]  }
  0x66   : > { %v212_v1 = vstv %s343_s26  ;;  %v205_v3 = vstv %s201_s20  ;;  %p476_p10 = pnand %p475_p2, %p815_p6  ;;  %s478_s10 = sshll.u32 %s552_s0, 4  ;;  %s479_s10 = int_to_ptr.vmem [resolvable:$false] %s478_s10 }
  0x67   : > { %vm213_vm0 = vcmp.gt.f32.partialorder %v203_v0, %v212_v1  ;;  %vm206_vm1 = vcmp.lt.f32.partialorder %v203_v0, %v205_v3  ;;  %vm209_vm2 = vcmp.gt.f32.partialorder %v203_v0, %v205_v3  ;;  %s480_s11 = scalar_lea.vmem %s479_s10, 256  ;;  %p481_p11 = scmp.lt.s32.totalorder %s752_s13, %s479_s10 }
  0x68   : > { %v344_v6 = vsel %vm206_vm1, 1.0, %v551_v5  ;;  %v345_v7 = vsel %vm209_vm2, 1.0, %v551_v5  ;;  %v346_v8 = vsel %vm213_vm0, 1.0, %v551_v5  ;;  %p477_p8 = pneg %p476_p10  ;;  %p482_p12 = scmp.lt.s32.totalorder %s480_s11, %s474_s8 }
  0x69   : > { %v216_v9 = vmul.f32 %v344_v6, %v204_v2  ;;  %v219_v10 = vmul.f32 %v346_v8, %v218_v4  ;;  %v222_v13 = vmul.f32 %v345_v7, %v204_v2 }
  0x6a   : > { %p483_p3 = por %p482_p12, %p481_p11 }
  0x6b   : > { %v217_v11 = vmul.f32 %v216_v9, %v203_v0  ;;  %v220_v12 = vmul.f32 %v219_v10, %v203_v0 }
  0x6c   : > { %p484_p4 = pnand %p483_p3, %p477_p8 }
  0x6d   : > { %v221_v14 = vadd.f32 %v220_v12, %v217_v11 }
  0x6f   : > { %v223_v15 = vadd.f32 %v222_v13, %v221_v14 }
  0x71   : > { %224 = vst [vmem:[%s200_s5] sm:$0xff] %v223_v15 }
  0x72   : > { %487 = shalt.err (!%p484_p4)
}
  0x73   : > { %s488_s12 = scalar_lea.hbm %s757_s29, 128  ;;  %s492_s21 = scalar_lea.hbm %s802_s3, 256 }
  0x74   : > { %p489_p0 = scmp.ne.s32.totalorder %s757_s29, %s488_s12  ;;  %p493_p7 = scmp.lt.u32.totalorder %s757_s29, %s802_s3 }
  0x75   : > { %p494_p13 = scmp.lt.u32.totalorder %s492_s21, %s488_s12  ;;  %p496_p2 = scmp.lt.u32.totalorder %s488_s12, %s757_s29 }
  0x76   : > { %p490_p1 = pnand %p489_p0, %p815_p6 }
  0x77   : > { %p495_p9 = por %p494_p13, %p493_p7 }
  0x78   : > { %p491_p5 = pneg %p490_p1 }
  0x79   : > { %p497_p10 = por %p496_p2, %p495_p9 }
  0x7b   : > { %p498_p8 = pnand %p497_p10, %p491_p5 }
  0x7d   : > { %501 = shalt.err (!%p498_p8)
}
  0x7e   : > { %355 = dma.vmem_to_hbm [thread:$0]  (%p815_p6), %s752_s13, 128, %s757_s29, %s226_s4  }
  0x7f PF: > { %s251_s14 = sand.u32 1, %s534_s22   ;;  %p816_p11 = scmp.ne.s32.totalorder %s808_s7, 0 }
  0x80   : > { %p817_p12 = scmp.ge.s32.totalorder %s546_s25, 2  ;;  %s252_s20 = scalar_lea.sflag [#allocation6], %s251_s14 }
  0x82   : > { %p365_p3 = pnand %p817_p12, %p816_p11 }
  0x84   : > { %529 = dma.done.wait (!%p365_p3), %s252_s20, 128  }
  0x85   : > { %531 = vsyncadd (!%p365_p3), %s252_s20, 4294967168  ;;  %p23_p4 = scmp.ge.s32.totalorder %s610_s27, 4   ;;  %s818_s22 = smov %s538_s23 }
  0x86   : > { %s819_s23 = smov %s542_s24  ;;  %s820_s24 = smov %s622_s30 }
  0x87   : > { %s821_s25 = smov %s610_s27  ;;  %25 = sbr.rel (!%p23_p4) target bundleno = 19 (0x13), region = 86 }
  0x8e   :  { %257 = vsyncpa [#allocation5], 1 }
  0x8f   :  { %259 = vsyncpa [#allocation5 + $0x1], 1 }
  0x90   :  { %260 = vsyncpa [#allocation8], 1 }
  0x91   :  { %262 = vsyncpa [#allocation8 + $0x1], 1 }
  0x92   :  { %263 = vsyncpa [#allocation6], 1 }
  0x93   :  { %265 = vsyncpa [#allocation6 + $0x1], 1 }

</bundles_post_ra>
